<compile_context>
chip_gen: v5e
topology: v5e:2x2
jax: 0.10.0
libtpu: 0.0.40
codegen_flags: <defaults>
</compile_context>

<pallas_src>
import jax
import jax.numpy as jnp
from jax.experimental import pallas as pl
from jax.experimental.pallas import tpu as pltpu


def _round_up(n, m):
    return ((n + m - 1) // m) * m


# --------------------------------------------------------------------------------------
# Pallas kernel 1: gated combine ("bmm") — one batched bf16 GEMM over all (b, tap) rows
# --------------------------------------------------------------------------------------
def _combine_kernel(rtg_ref, w2_ref, o_ref):
    # rtg_ref: (TM, EKK) bf16   rows are (b, tap_j) pairs of gate-scaled rotation coeffs
    # w2_ref : (EKK, TN) bf16   expert weights, resident across the row grid
    # o_ref  : (TM, TN)  bf16   combined per-(b, tap) weights, lane-dense columns
    o_ref[...] = jnp.dot(rtg_ref[...], w2_ref[...],
                         preferred_element_type=jnp.float32).astype(o_ref.dtype)


def combine_weights(rtg2d, w2p, *, tm, tn):
    R, EKK = rtg2d.shape
    Mp = w2p.shape[1]
    return pl.pallas_call(
        _combine_kernel,
        out_shape=jax.ShapeDtypeStruct((R, Mp), jnp.bfloat16),
        grid=(R // tm, Mp // tn),
        in_specs=[
            pl.BlockSpec((tm, EKK), lambda i, j: (i, 0)),
            pl.BlockSpec((EKK, tn), lambda i, j: (0, j)),   # resident weight block
        ],
        out_specs=pl.BlockSpec((tm, tn), lambda i, j: (i, j)),
        compiler_params=pltpu.CompilerParams(
            dimension_semantics=("parallel", "parallel"),
            vmem_limit_bytes=32 * 1024 * 1024),
    )(rtg2d, w2p)


# --------------------------------------------------------------------------------------
# Pallas kernel 2: per-sample conv — im2col slab in VMEM scratch + one big MXU dot per tile
# --------------------------------------------------------------------------------------
def _make_conv_kernel(k, dilation, wp, span_t, cin_p):
    def kernel(w_ref, x_ref, o_ref, slab_ref):
        # w_ref   : (1, cout_t, KK*cin_p) bf16   per-sample im2col weights, this Cout tile
        # x_ref   : (1, cin_p, L)         bf16   row-flattened padded input (whole sample)
        # o_ref   : (1, cout_t, span_t)   f32
        # slab_ref: (KK*cin_p, span_t)    bf16   im2col slab, built once per (b, span tile)
        s = pl.program_id(1)
        base = pl.multiple_of(s * span_t, 128)

        @pl.when(pl.program_id(2) == 0)      # build slab only on the first Cout tile
        def _build_slab():
            for ky in range(k):              # K*K = 9 taps: short static unroll
                for kx in range(k):
                    j = ky * k + kx
                    start = base + (ky * wp + kx) * dilation
                    slab_ref[j * cin_p:(j + 1) * cin_p, :] = (
                        x_ref[0, :, pl.ds(start, span_t)])

        # Single MXU dot with a KK*Cin-deep contraction.
        o_ref[0] = jnp.dot(w_ref[0], slab_ref[...],
                           preferred_element_type=jnp.float32)
    return kernel


def per_sample_conv(w_i2c, x_flat, *, k, dilation, wp, span_pad, span_t, cout_t):
    B, cout_p, kkcin = w_i2c.shape
    _, cin_p, L = x_flat.shape
    n_span = span_pad // span_t
    n_cout = cout_p // cout_t
    kernel = _make_conv_kernel(k, dilation, wp, span_t, cin_p)
    return pl.pallas_call(
        kernel,
        out_shape=jax.ShapeDtypeStruct((B, cout_p, span_pad), jnp.float32),
        grid=(B, n_span, n_cout),            # cout innermost -> slab reused across Cout tiles
        in_specs=[
            pl.BlockSpec((1, cout_t, kkcin), lambda b, s, c: (b, c, 0)),
            # Whole-sample input block; constant in (s, c) so it is not re-fetched.
            # TODO(synk): if profiling shows exposed DMA, add pipeline_mode=pl.Buffered(3).
            pl.BlockSpec((1, cin_p, L), lambda b, s, c: (b, 0, 0)),
        ],
        out_specs=pl.BlockSpec((1, cout_t, span_t), lambda b, s, c: (b, c, s)),
        scratch_shapes=[pltpu.VMEM((k * k * cin_p, span_t), jnp.bfloat16)],
        compiler_params=pltpu.CompilerParams(
            dimension_semantics=("parallel", "parallel", "arbitrary"),
            vmem_limit_bytes=32 * 1024 * 1024),
    )(w_i2c, x_flat)


# --------------------------------------------------------------------------------------
# JAX glue
# --------------------------------------------------------------------------------------
def _rotation_interp_matrices(theta, k):
    """theta: (B, E) radians. Returns M: (B, E, k*k, k*k) with
    rotated_flat[..., j] = sum_i M[..., j, i] * orig_flat[..., i]
    (bilinear resampling of the kxk tap grid rotated by theta, zero outside)."""
    r = jnp.arange(k, dtype=jnp.float32) - (k - 1) / 2.0
    gy, gx = jnp.meshgrid(r, r, indexing="ij")
    gy = gy.reshape(-1)
    gx = gx.reshape(-1)
    c = jnp.cos(theta)[..., None]   # (B, E, 1)
    s = jnp.sin(theta)[..., None]
    sy = c * gy + s * gx            # inverse-rotated source coordinates, (B, E, KK)
    sx = -s * gy + c * gx
    wy = jnp.maximum(0.0, 1.0 - jnp.abs(sy[..., :, None] - gy))   # (B, E, KK_j, KK_i)
    wx = jnp.maximum(0.0, 1.0 - jnp.abs(sx[..., :, None] - gx))
    return wy * wx


def cond_rot_conv2d_bmm(x, weight, fa_w, fa_b, ft_w, ft_b, *,
                        num_experts, out_channels, kernel_size,
                        stride=1, padding=0, dilation=1, groups=1, proportion=1.0):
    assert stride == 1 and groups == 1  # TODO(synk): general stride / groups not implemented
    B, Cin, H, W = x.shape
    E, Cout, K = num_experts, out_channels, kernel_size
    KK = K * K

    xf = x.astype(jnp.float32)
    avg = xf.mean(axis=(2, 3))                                    # (B, Cin)
    gate = jax.nn.sigmoid(avg @ fa_w.T + fa_b)                    # (B, E)
    theta = jax.nn.sigmoid(avg @ ft_w.T + ft_b) * proportion      # (B, E)

    # --- combine (Pallas kernel 1): one bf16 GEMM over B*KK rows -----------------------
    m_rot = _rotation_interp_matrices(theta, K)                   # (B, E, KK_j, KK_i)
    rtg = gate[:, :, None, None] * m_rot                          # fold gate
    rtg2d = jnp.transpose(rtg, (0, 2, 1, 3)).reshape(B * KK, E * KK)   # rows=(b,j), cols=(e,i)

    M = Cout * Cin
    w4 = weight.reshape(E, Cout, Cin, KK).astype(jnp.float32)
    w2 = jnp.transpose(w4, (0, 3, 1, 2)).reshape(E * KK, M)       # rows=(e,i), cols=(co,ci)

    Mp = _round_up(M, 128)
    tn = Mp if Mp <= 512 else 256
    Mp = _round_up(Mp, tn)
    tm = 128 if B * KK >= 128 else _round_up(B * KK, 8)
    Rp = _round_up(B * KK, tm)

    rtg2d_p = jnp.pad(rtg2d, ((0, Rp - B * KK), (0, 0))).astype(jnp.bfloat16)
    w2_p = jnp.pad(w2, ((0, 0), (0, Mp - M))).astype(jnp.bfloat16)

    comb = combine_weights(rtg2d_p, w2_p, tm=tm, tn=tn)           # (Rp, Mp) bf16  [Pallas]
    w_taps = comb[:B * KK, :M].reshape(B, KK, Cout, Cin)          # strip padding

    # Re-layout to im2col weight order (Cout, KK*Cin) with sublane-padded Cin/Cout
    # (tiny tensor; metadata-level XLA work between the two Pallas calls).
    Cin_p = _round_up(Cin, 8)
    Cout_p = _round_up(Cout, 8)
    cout_t = min(256, Cout_p)
    Cout_p = _round_up(Cout_p, cout_t)
    w_i2c = jnp.transpose(w_taps, (0, 2, 1, 3))                   # (B, Cout, KK, Cin)
    w_i2c = jnp.pad(w_i2c, ((0, 0), (0, Cout_p - Cout), (0, 0), (0, Cin_p - Cin)))
    w_i2c = w_i2c.reshape(B, Cout_p, KK * Cin_p)                  # already bf16

    # --- per-sample conv (Pallas kernel 2) ---------------------------------------------
    OH = H + 2 * padding - dilation * (K - 1)
    OW = W + 2 * padding - dilation * (K - 1)
    Hp, Wp = H + 2 * padding, W + 2 * padding
    span = OH * Wp                                                # "span" layout (junk cols)
    span_t = min(1024, _round_up(span, 128))                      # lane-dense output tile
    span_pad = _round_up(span, span_t)
    L = _round_up(span_pad + dilation * (K - 1) * (Wp + 1), 128)  # covers every tap offset

    x_pad = jnp.pad(xf, ((0, 0), (0, Cin_p - Cin),
                         (padding, padding), (padding, padding)))
    x_flat = x_pad.reshape(B, Cin_p, Hp * Wp)
    x_flat = jnp.pad(x_flat, ((0, 0), (0, 0), (0, L - Hp * Wp))).astype(jnp.bfloat16)

    out_span = per_sample_conv(w_i2c, x_flat, k=K, dilation=dilation, wp=Wp,
                               span_pad=span_pad, span_t=span_t, cout_t=cout_t)
    # Strip Cout / span padding and the per-row junk columns of the span layout.
    out = out_span[:, :Cout, :span].reshape(B, Cout, OH, Wp)[:, :, :, :OW]
    return out


def reference_forward(x, weight, fa_w, fa_b, ft_w, ft_b, *,
                      num_experts, out_channels, kernel_size,
                      padding=0, dilation=1, proportion=1.0):
    """Pure-JAX f32 reference replicating the same math (for a correctness check)."""
    B, Cin, H, W = x.shape
    E, Cout, K = num_experts, out_channels, kernel_size
    avg = x.mean(axis=(2, 3))
    gate = jax.nn.sigmoid(avg @ fa_w.T + fa_b)
    theta = jax.nn.sigmoid(avg @ ft_w.T + ft_b) * proportion
    m_rot = _rotation_interp_matrices(theta, K)
    w5 = weight.reshape(E, Cout, Cin, K * K)
    rotated = jnp.einsum("eoci,beji->beocj", w5, m_rot)
    combined = jnp.einsum("be,beocj->bocj", gate, rotated).reshape(B, Cout, Cin, K, K)
    oh = (H + 2 * padding - dilation * (K - 1) - 1) + 1
    ow = (W + 2 * padding - dilation * (K - 1) - 1) + 1
    x_pad = jnp.pad(x, ((0, 0), (0, 0), (padding, padding), (padding, padding)))
    out = jnp.zeros((B, Cout, oh, ow), jnp.float32)
    for ky in range(K):
        for kx in range(K):
            xs = x_pad[:, :, ky * dilation:ky * dilation + oh,
                       kx * dilation:kx * dilation + ow]
            out = out + jnp.einsum("boc,bchw->bohw", combined[:, :, :, ky, kx], xs)
    return out


if __name__ == "__main__":
    B, Cin, H, W = 2, 4, 16, 16
    E, Cout, K = 4, 4, 3
    padding, dilation, proportion = 1, 1, 1.0

    key = jax.random.PRNGKey(0)
    k1, k2, k3, k4, k5, k6 = jax.random.split(key, 6)
    x = jax.random.normal(k1, (B, Cin, H, W), jnp.float32)
    weight = 0.1 * jax.random.normal(k2, (E * Cout, Cin, K, K), jnp.float32)
    fa_w = 0.1 * jax.random.normal(k3, (E, Cin), jnp.float32)
    fa_b = 0.1 * jax.random.normal(k4, (E,), jnp.float32)
    ft_w = 0.1 * jax.random.normal(k5, (E, Cin), jnp.float32)
    ft_b = 0.1 * jax.random.normal(k6, (E,), jnp.float32)

    out = cond_rot_conv2d_bmm(
        x, weight, fa_w, fa_b, ft_w, ft_b,
        num_experts=E, out_channels=Cout, kernel_size=K,
        padding=padding, dilation=dilation, proportion=proportion)
    out = jax.block_until_ready(out)

    ref = reference_forward(
        x, weight, fa_w, fa_b, ft_w, ft_b,
        num_experts=E, out_channels=Cout, kernel_size=K,
        padding=padding, dilation=dilation, proportion=proportion)

    assert out.shape == (B, Cout, H, W), out.shape
    # bf16 MXU operands on BOTH kernels (combine inputs + conv inputs) with f32 accumulation
    # -> slightly relaxed tolerance vs the pure-f32 reference.
    assert bool(jnp.allclose(out, ref, atol=3e-2, rtol=3e-2)), "mismatch vs JAX reference"
    print("KERNEL_OK")
</pallas_src>

<mosaic_0001>
module attributes {stable_mosaic.version = 11 : i64} {
  func.func @_combine_kernel(%arg0: i32, %arg1: i32, %arg2: memref<24x36xbf16, #tpu.memory_space<vmem>>, %arg3: memref<36x128xbf16, #tpu.memory_space<vmem>>, %arg4: memref<24x128xbf16, #tpu.memory_space<vmem>>) attributes {dimension_semantics = [#tpu.dimension_semantics<parallel>, #tpu.dimension_semantics<parallel>], iteration_bounds = array<i64: 1, 1>, scalar_prefetch = 0 : i64, scratch_operands = 0 : i64, tpu.core_type = #tpu.core_type<tc>, window_params = [{transform_indices = @transform_0, window_bounds = array<i64: 24, 36>}, {transform_indices = @transform_1, window_bounds = array<i64: 36, 128>}, {transform_indices = @transform_2, window_bounds = array<i64: 24, 128>}]} {
    %c0 = arith.constant 0 : index
    %c0_0 = arith.constant 0 : index
    %0 = vector.load %arg2[%c0, %c0_0] : memref<24x36xbf16, #tpu.memory_space<vmem>>, vector<24x36xbf16>
    %c0_1 = arith.constant 0 : index
    %c0_2 = arith.constant 0 : index
    %1 = vector.load %arg3[%c0_1, %c0_2] : memref<36x128xbf16, #tpu.memory_space<vmem>>, vector<36x128xbf16>
    %cst = arith.constant dense<0.000000e+00> : vector<24x128xf32>
    %2 = tpu.matmul %0, %1, %cst {dimension_numbers = #tpu.dot_dimension_numbers<[1], [0], [0], [1], [0, 0, 1, 1], [], []>} : vector<24x36xbf16>, vector<36x128xbf16>, vector<24x128xf32> -> vector<24x128xf32>
    %3 = arith.truncf %2 : vector<24x128xf32> to vector<24x128xbf16>
    %c0_3 = arith.constant 0 : index
    %c0_4 = arith.constant 0 : index
    %4 = vector.load %arg4[%c0_3, %c0_4] : memref<24x128xbf16, #tpu.memory_space<vmem>>, vector<24x128xbf16>
    tpu.vector_store %arg4[%c0_3, %c0_4], %3 {strides = array<i32>} : memref<24x128xbf16, #tpu.memory_space<vmem>>, vector<24x128xbf16>,
    return
  }
  func.func @transform_0(%arg0: i32, %arg1: i32) -> (i32, i32) {
    %c0_i32 = arith.constant 0 : i32
    %c0_i32_0 = arith.constant 0 : i32
    return %arg0, %c0_i32 : i32, i32
  }
  func.func @transform_1(%arg0: i32, %arg1: i32) -> (i32, i32) {
    %c0_i32 = arith.constant 0 : i32
    %c0_i32_0 = arith.constant 0 : i32
    return %c0_i32, %arg1 : i32, i32
  }
  func.func @transform_2(%arg0: i32, %arg1: i32) -> (i32, i32) {
    %c0_i32 = arith.constant 0 : i32
    return %arg0, %arg1 : i32, i32
  }
}

</mosaic_0001>

<bundles_post_ra>
// kernel: tpu_custom_call.1
= control target key start
LH: loop header
LB: loop body
LE: loop exit
PB: predicated region body
PF: predicated region fallthrough
CT: control target
= control target key end

     0   :  { %7 = vsyncpa [#allocation3], 0  ;;  %s277_s0 = inlined_call_operand.hbm [shape: bf16[24,36], index: 0, kind: input, shape index: {}]   ;;  %s278_s1 = inlined_call_operand.hbm [shape: bf16[36,128], index: 1, kind: input, shape index: {}]   ;;  %s279_s2 = inlined_call_operand.hbm [shape: bf16[24,128], index: 2, kind: output, shape index: {}]  }
   0x1   :  { %8 = vsyncpa [#allocation6], 0 }
   0x2   :  { %9 = vsyncpa [#allocation4], 0  ;;  %s14_s11 = sshll.u32 %s277_s0, 4  ;;  %s239_s12 = smov [#allocation2]   ;;  %s15_s11 = int_to_ptr.hbm [resolvable:$true] %s14_s11 }
   0x3   :  { %s16_s13 = sshll.u32 %s239_s12, 4  ;;  %s27_s16 = sshll.u32 %s278_s1, 4  ;;  %s17_s13 = int_to_ptr.vmem [resolvable:$true] %s16_s13  ;;  %s28_s16 = int_to_ptr.hbm [resolvable:$true] %s27_s16 }
   0x4   :  { %s240_s17 = smov 64   ;;  %s241_s18 = smov 4  }
   0x5   :  { %22 = dma.hbm_to_vmem [thread:$0]  %s15_s11, 192, %s17_s13, [#allocation3], %s240_s17, %s240_s17, %s241_s18  }
   0x6   :  { %s242_s19 = smov [#allocation5]  }
   0x7   :  { %s29_s20 = sshll.u32 %s242_s19, 4  ;;  %s30_s20 = int_to_ptr.vmem [resolvable:$true] %s29_s20 }
   0x8   :  { %35 = dma.hbm_to_vmem [thread:$0]  %s28_s16, 320, %s30_s20, [#allocation6], %s240_s17, %s240_s17, %s241_s18  }
   0x9   :  { %233 = dma.done.wait [#allocation3], 192  }
   0xa   :  { %234 = vsyncadd [#allocation3], 4294967104 }
   0xb   :  { %235 = dma.done.wait [#allocation6], 320  }
   0xc   :  { %236 = vsyncadd [#allocation6], 4294966976  ;;  %v52_v0 = vld [vmem:[#allocation5 + $0x10] sm:$0x3]  ;;  %vm83_vm0 = vcmask 1041408   ;;  %v147_v4 = vld [vmem:[#allocation5 + $0x8] sm:$0xff] }
   0xd   :  { %v70_v1 = vunpack.c.l.b16 %v52_v0  ;;  %v47_v5 = vld [vmem:[#allocation2 + $0x8] sm:$0xf]  ;;  %v146_v7 = vld [vmem:[#allocation5] sm:$0xff]  ;;  %v145_v8 = vld [vmem:[#allocation2] sm:$0xff]  ;;  %vm76_vm1 = vcmask 293888   ;;  %s243_s0 = smov [#allocation7]  }
   0xe   :  { %v58_v6 = vunpack.c.l.b16 %v47_v5  ;;  %s115_s1 = sshll.u32 %s243_s0, 4  ;;  %s117_s23 = sshll.u32 %s279_s2, 4  ;;  %s116_s1 = int_to_ptr.vmem [resolvable:$true] %s115_s1  ;;  %s118_s23 = int_to_ptr.hbm [resolvable:$true] %s117_s23 }
   0xf   :  { %v73_v2 = vpack.c.b16 %v70_v1, %v70_v1 }
  0x10   :  { %v60_v9 = vpack.c.b16 %v58_v6, %v58_v6 }
  0x11   :  { %v85_v3 = vsel %vm83_vm0, %v73_v2, 0 }
  0x12   :  { %92 = vmatpush.bf16.msra.mxu0 %v85_v3  ;;  %153 = vmatpush.bf16.msra.mxu1 %v85_v3 }
  0x16   :  { %93 = vmatpush.bf16.msra.mxu0 %v147_v4  ;;  %154 = vmatpush.bf16.msra.mxu1 %v147_v4 }
  0x1a   :  { %94 = vmatpush.bf16.msra.mxu0 %v146_v7  ;;  %155 = vmatpush.bf16.msra.mxu1 %v146_v7 }
  0x1d   :  { %143 = vmatmul.msk.bf16.vlgmr.msra.gmra.mxu0 %vm76_vm1, %v145_v8  ;;  %144 = vmatmul.msk.bf16.vlgmr.msra.gmra.mxu1 %vm76_vm1, %v60_v9 }
  0x9a   :  { %v96_v10 = vpop.f32.mrf.mxu0  ;;  %v101_v11 = vpop.f32.mrf.mxu1 }
  0x9b   :  { %v107_v12 = vpack.c.bf16 %v101_v11, %v101_v11 }
  0x9d   :  { %110 = vst [vmem:[#allocation7 + $0x8] sm:$0xf] %v107_v12 }
  0xa2   :  { %v98_v13 = vpop.f32.mrf.mxu0  ;;  %v103_v14 = vpop.f32.mrf.mxu1 }
  0xa3   :  { %v151_v15 = vpack.c.bf16 %v98_v13, %v96_v10 }
  0xa5   :  { %152 = vst [vmem:[#allocation7] sm:$0xff] %v151_v15  }
  0xa6   :  { %123 = dma.vmem_to_hbm [thread:$0]  %s116_s1, 192, %s118_s23, [#allocation4], %s240_s17, %s240_s17, %s241_s18  }
  0xa7   :  { %237 = dma.done.wait [#allocation4], 192  }
  0xa8   :  { %238 = vsyncadd [#allocation4], 4294967104 }
  0xa9   :  { %128 = vsyncpa [#allocation3], 1 }
  0xaa   :  { %129 = vsyncpa [#allocation6], 1 }
  0xab   :  { %130 = vsyncpa [#allocation4], 1 }

</bundles_post_ra>
